<compile_context>
chip_gen: v7x
topology: tpu7x:2x2x1
jax: 0.10.0
libtpu: 0.0.40
codegen_flags: <defaults>
</compile_context>

<pallas_src>
import functools

import jax
import jax.numpy as jnp
from jax.experimental import pallas as pl
from jax.experimental.pallas import tpu as pltpu


def _round_up(a: int, b: int) -> int:
    return ((a + b - 1) // b) * b


def _linear_kernel(x_ref, w_ref, b_ref, o_ref):
    """One (tm, tn) output tile. x_ref: (tm, K); w_ref: (K, tn); b_ref: (1, tn) f32."""
    acc = jnp.dot(x_ref[...], w_ref[...], preferred_element_type=jnp.float32)
    o_ref[...] = (acc + b_ref[...]).astype(o_ref.dtype)


def prepare_linear_adapter_params(weight_nk, bias_n, *, use_bf16=True):
    """One-time (out-of-jit) parameter prep.

    Transposes the PyTorch (out, in) = (N, K) weight to (K, N) and casts it to the
    MXU compute dtype; bias becomes a (1, N) float32 row. Do this at module init,
    NOT per forward call.

    use_bf16=True changes operand precision vs. the f32 PyTorch Linear (accumulation
    stays f32); pass use_bf16=False for f32 operands.
    """
    w = jnp.asarray(weight_nk)
    compute_dtype = jnp.bfloat16 if use_bf16 else w.dtype
    w_kn = w.T.astype(compute_dtype)                              # (K, N), materialized once
    b_2d = jnp.asarray(bias_n).reshape(1, -1).astype(jnp.float32)  # (1, N)
    return w_kn, b_2d


def linear_adapter_forward(x, w_kn, bias_2d, mask_pad, *, tm=256, tn=1024,
                           vmem_budget_bytes=None):
    """Pallas equivalent of LinearAdapter.forward.

    x:        (B, T, K)
    w_kn:     (K, N)  pre-transposed / pre-cast weight (prepare_linear_adapter_params)
    bias_2d:  (1, N)  float32
    mask_pad: any array (passed through unchanged)
    returns:  ((B, T, N), mask_pad)
    """
    B, T, K = x.shape
    Kw, N = w_kn.shape
    assert Kw == K, (Kw, K)
    M = B * T
    out_dtype = x.dtype

    compute_dtype = w_kn.dtype
    cbytes = jnp.dtype(compute_dtype).itemsize
    obytes = jnp.dtype(out_dtype).itemsize

    # Only the (small) activations are cast per call; the weight is already prepared.
    x2d = x.reshape(M, K).astype(compute_dtype)

    # ---- generation-aware VMEM budget ----------------------------------------
    try:
        vmem_cap = int(pltpu.get_tpu_info().vmem_capacity_bytes)
    except Exception:
        vmem_cap = 64 << 20            # conservative fallback: v7x per-TC VMEM
    budget = (vmem_budget_bytes if vmem_budget_bytes is not None
              else max(16 << 20, int(vmem_cap * 0.45)))  # ~28 MiB v7x, ~57 MiB v5e/v6e

    def vmem_estimate(tm_, tn_):
        return (2 * (tm_ * K * cbytes          # x tile (double-buffered)
                     + K * tn_ * cbytes        # weight tile (double-buffered)
                     + tn_ * 4                 # bias tile (f32)
                     + tm_ * tn_ * obytes)     # output tile (double-buffered)
                + tm_ * tn_ * 4)               # f32 matmul accumulator temp

    # ---- tile selection -------------------------------------------------------
    tm = max(8, min(tm, _round_up(M, 8)))
    tn = max(128, min(tn, _round_up(N, 128)))

    # If the whole M dimension fits, make x a single resident tile so the weight
    # streams exactly once with no re-streaming of x across the N axis.
    full_tm = _round_up(M, 8)
    if vmem_estimate(full_tm, tn) <= budget:
        tm = full_tm

    # Shrink under the budget: prefer shrinking tm; keep tn >= 256 as long as
    # possible (full-width weight pushes for v6e/v7x 256-wide MXUs).
    while vmem_estimate(tm, tn) > budget:
        if tm > 128:
            tm = max(128, ((tm // 2) // 8) * 8)
        elif tn > 256:
            tn = max(256, ((tn // 2) // 128) * 128)
        elif tm > 8:
            tm = max(8, ((tm // 2) // 8) * 8)
        elif tn > 128:
            tn = 128
        else:
            break
    # TODO(synk): if enc_out_dim were ever so large that even (8, 128) tiles with a
    # full-K block exceed VMEM, re-introduce a K grid axis with an f32 accumulator.

    grid_i = pl.cdiv(M, tm)   # M tiles
    grid_j = pl.cdiv(N, tn)   # N tiles

    # Stream the larger operand exactly once. For typical adapter shapes (small
    # B*T) the weight dominates, so N is the OUTER grid axis: each weight tile is
    # DMA'd a single time (and v7x megacore splits disjoint weight ranges across
    # TCs), while the small x matrix stays resident / is cheaply re-streamed.
    n_outer = (K * N) >= (M * K)

    def _ij(*g):
        return (g[1], g[0]) if n_outer else (g[0], g[1])

    grid = (grid_j, grid_i) if n_outer else (grid_i, grid_j)
    x_spec = pl.BlockSpec((tm, K), lambda *g: (_ij(*g)[0], 0))
    w_spec = pl.BlockSpec((K, tn), lambda *g: (0, _ij(*g)[1]))
    b_spec = pl.BlockSpec((1, tn), lambda *g: (0, _ij(*g)[1]))
    o_spec = pl.BlockSpec((tm, tn), _ij)
    # TODO(synk): if xprof shows exposed weight DMA at outer-j boundaries when
    # grid_i is small, add pipeline_mode=pl.Buffered(3) to w_spec.

    est = vmem_estimate(tm, tn)
    vmem_limit = int(min(vmem_cap, max(est + (8 << 20), 32 << 20)))

    out2d = pl.pallas_call(
        _linear_kernel,
        out_shape=jax.ShapeDtypeStruct((M, N), out_dtype),
        grid_spec=pltpu.PrefetchScalarGridSpec(
            num_scalar_prefetch=0,
            grid=grid,
            in_specs=[x_spec, w_spec, b_spec],
            out_specs=o_spec,
        ),
        compiler_params=pltpu.CompilerParams(
            dimension_semantics=("parallel", "parallel"),
            vmem_limit_bytes=vmem_limit,
        ),
    )(x2d, w_kn, bias_2d)

    # (M, N) -> (B, T, N) is a free row-major reshape (no copy, no slice).
    return out2d.reshape(B, T, N), mask_pad


if __name__ == "__main__":
    # Small shapes consistent with the module (enc_out_dim -> llm_embed_dim).
    B, T = 2, 8
    ENC_OUT_DIM = 256
    LLM_EMBED_DIM = 1024

    key = jax.random.PRNGKey(0)
    kx, kw, kb = jax.random.split(key, 3)

    x = jax.random.normal(kx, (B, T, ENC_OUT_DIM), dtype=jnp.float32)
    # Deterministic "Linear" params (PyTorch layout: weight = (out, in)).
    weight = jax.random.normal(kw, (LLM_EMBED_DIM, ENC_OUT_DIM), dtype=jnp.float32) * 0.02
    bias = jax.random.normal(kb, (LLM_EMBED_DIM,), dtype=jnp.float32) * 0.02
    mask_pad = jnp.ones((B, 1, T), dtype=jnp.bool_)

    # --- Default path: bf16 MXU operands (prepared once), f32 accumulation ---
    w_kn, b2d = prepare_linear_adapter_params(weight, bias, use_bf16=True)
    fwd = jax.jit(linear_adapter_forward)
    out, mask_out = fwd(x, w_kn, b2d, mask_pad)
    jax.block_until_ready(out)
    jax.block_until_ready(mask_out)

    assert out.shape == (B, T, LLM_EMBED_DIM)
    assert mask_out.shape == mask_pad.shape

    # Reference with matching bf16-operand / f32-accumulate precision.
    ref_bf16 = jnp.einsum(
        "btk,nk->btn",
        x.astype(jnp.bfloat16).astype(jnp.float32),
        weight.astype(jnp.bfloat16).astype(jnp.float32),
    ) + bias
    assert jnp.allclose(out, ref_bf16, atol=2e-3, rtol=2e-3)
    # Sanity vs. the full-f32 reference (bf16 rounding only).
    ref_f32 = jnp.einsum("btk,nk->btn", x, weight) + bias
    assert jnp.allclose(out, ref_f32, atol=5e-2, rtol=5e-2)

    # --- f32 path + non-tile-aligned dims to exercise ragged boundary masking ---
    B2, T2, ENC2, LLM2 = 2, 7, 200, 300
    x2 = jax.random.normal(kx, (B2, T2, ENC2), dtype=jnp.float32)
    w2 = jax.random.normal(kw, (LLM2, ENC2), dtype=jnp.float32) * 0.02
    b2 = jax.random.normal(kb, (LLM2,), dtype=jnp.float32) * 0.02
    mask2 = jnp.ones((B2, 1, T2), dtype=jnp.bool_)

    w2_kn, b2_2d = prepare_linear_adapter_params(w2, b2, use_bf16=False)
    out2, mask_out2 = fwd(x2, w2_kn, b2_2d, mask2)
    jax.block_until_ready(out2)

    ref2 = jnp.einsum("btk,nk->btn", x2, w2) + b2
    assert out2.shape == (B2, T2, LLM2)
    assert mask_out2.shape == mask2.shape
    assert jnp.allclose(out2, ref2, atol=1e-4, rtol=1e-4)

    print("KERNEL_OK")
</pallas_src>

<mosaic_0001>
module attributes {stable_mosaic.version = 11 : i64} {
  func.func @_linear_kernel(%arg0: i32, %arg1: i32, %arg2: memref<16x256xbf16, #tpu.memory_space<vmem>>, %arg3: memref<256x1024xbf16, #tpu.memory_space<vmem>>, %arg4: memref<1x1024xf32, #tpu.memory_space<vmem>>, %arg5: memref<16x1024xf32, #tpu.memory_space<vmem>>) attributes {dimension_semantics = [#tpu.dimension_semantics<parallel>, #tpu.dimension_semantics<parallel>], iteration_bounds = array<i64: 1, 1>, scalar_prefetch = 0 : i64, scratch_operands = 0 : i64, tpu.core_type = #tpu.core_type<tc>, window_params = [{transform_indices = @transform_0, window_bounds = array<i64: 16, 256>}, {transform_indices = @transform_1, window_bounds = array<i64: 256, 1024>}, {transform_indices = @transform_2, window_bounds = array<i64: 1, 1024>}, {transform_indices = @transform_3, window_bounds = array<i64: 16, 1024>}]} {
    %c0 = arith.constant 0 : index
    %c0_0 = arith.constant 0 : index
    %0 = vector.load %arg2[%c0, %c0_0] : memref<16x256xbf16, #tpu.memory_space<vmem>>, vector<16x256xbf16>
    %c0_1 = arith.constant 0 : index
    %c0_2 = arith.constant 0 : index
    %1 = vector.load %arg3[%c0_1, %c0_2] : memref<256x1024xbf16, #tpu.memory_space<vmem>>, vector<256x1024xbf16>
    %cst = arith.constant dense<0.000000e+00> : vector<16x1024xf32>
    %2 = tpu.matmul %0, %1, %cst {dimension_numbers = #tpu.dot_dimension_numbers<[1], [0], [0], [1], [0, 0, 1, 1], [], []>} : vector<16x256xbf16>, vector<256x1024xbf16>, vector<16x1024xf32> -> vector<16x1024xf32>
    %c0_3 = arith.constant 0 : index
    %c0_4 = arith.constant 0 : index
    %3 = vector.load %arg4[%c0_3, %c0_4] : memref<1x1024xf32, #tpu.memory_space<vmem>>, vector<1x1024xf32>
    %4 = vector.broadcast %3 : vector<1x1024xf32> to vector<16x1024xf32>
    %5 = arith.addf %2, %4 : vector<16x1024xf32>
    %c0_5 = arith.constant 0 : index
    %c0_6 = arith.constant 0 : index
    %6 = vector.load %arg5[%c0_5, %c0_6] : memref<16x1024xf32, #tpu.memory_space<vmem>>, vector<16x1024xf32>
    tpu.vector_store %arg5[%c0_5, %c0_6], %5 {strides = array<i32>} : memref<16x1024xf32, #tpu.memory_space<vmem>>, vector<16x1024xf32>,
    return
  }
  func.func @transform_0(%arg0: i32, %arg1: i32) -> (i32, i32) {
    %c0_i32 = arith.constant 0 : i32
    %c0_i32_0 = arith.constant 0 : i32
    return %arg1, %c0_i32 : i32, i32
  }
  func.func @transform_1(%arg0: i32, %arg1: i32) -> (i32, i32) {
    %c0_i32 = arith.constant 0 : i32
    %c0_i32_0 = arith.constant 0 : i32
    return %c0_i32, %arg0 : i32, i32
  }
  func.func @transform_2(%arg0: i32, %arg1: i32) -> (i32, i32) {
    %c0_i32 = arith.constant 0 : i32
    %c0_i32_0 = arith.constant 0 : i32
    return %c0_i32, %arg0 : i32, i32
  }
  func.func @transform_3(%arg0: i32, %arg1: i32) -> (i32, i32) {
    %c0_i32 = arith.constant 0 : i32
    return %arg1, %arg0 : i32, i32
  }
}

</mosaic_0001>

<bundles_post_ra>
// kernel: linear_adapter_forward.1
= control target key start
LH: loop header
LB: loop body
LE: loop exit
PB: predicated region body
PF: predicated region fallthrough
CT: control target
= control target key end

     0   :  { %8 = vsyncpa [#allocation3], 0  ;;  %s1314_s0 = inlined_call_operand.vmem [shape: bf16[16,256], index: 0, kind: input, shape index: {}]   ;;  %s1315_s1 = inlined_call_operand.hbm [shape: bf16[256,1024], index: 1, kind: input, shape index: {}]   ;;  %s1316_s2 = inlined_call_operand.vmem [shape: f32[1,1024], index: 2, kind: input, shape index: {}]   ;;  %s1317_s3 = inlined_call_operand.hbm [shape: f32[16,1024], index: 3, kind: output, shape index: {}]  }
   0x1   :  { %9 = vsyncpa [#allocation4], 0  ;;  %s1243_s12 = smov [#allocation2]   ;;  %s1195_s16 = scalar_lea.hbm %s1315_s1, 16384 }
   0x2   :  { %s17_s13 = sshll.u32 %s1243_s12, 4  ;;  %p1196_p0 = scmp.ne.s32.totalorder %s1315_s1, %s1195_s16  ;;  %s18_s13 = int_to_ptr.vmem [resolvable:$true] %s17_s13 }
   0x3   :  { %p1199_p1 = scmp.lt.u32.totalorder %s1195_s16, %s1315_s1 }
   0x5   :  { %p1201_p2 = pnand %p1199_p1, %p1196_p0 }
   0x7   :  { %1204 = shalt.err (!%p1201_p2)
}
   0x8   :  { %s1205_s21 = scalar_lea.vmem %s18_s13, 16384  ;;  %p1210_p4 = scmp.lt.s32.totalorder %s18_s13, %s18_s13 }
   0x9   :  { %p1206_p3 = scmp.ne.s32.totalorder %s18_s13, %s1205_s21  ;;  %p1211_p5 = scmp.lt.s32.totalorder %s1205_s21, %s1205_s21 }
   0xb   :  { %p1212_p6 = por %p1211_p5, %p1210_p4 }
   0xd   :  { %p1213_p7 = pnand %p1212_p6, %p1206_p3 }
   0xf   :  { %1216 = shalt.err (!%p1213_p7)
}
  0x10   :  { %s1244_s22 = smov 512   ;;  %s1245_s23 = smov 32  }
  0x11   :  { %23 = dma.hbm_to_vmem [thread:$0]  %s1315_s1, 16384, %s18_s13, [#allocation3], %s1244_s22, %s1244_s22, %s1245_s23  }
  0x12   :  { %1239 = dma.done.wait [#allocation3], 16384  }
  0x13   :  { %1240 = vsyncadd [#allocation3], 4294950912  ;;  %v31_v0 = vld [vmem:[#allocation2] sm:$0xff]  ;;  %v32_v2 = vld [vmem:[#allocation2 + $0x8] sm:$0xff] }
  0x14   :  { %v35_v1 = vld [vmem:[#allocation2 + $0x20] sm:$0xff]  ;;  %v36_v4 = vld [vmem:[#allocation2 + $0x28] sm:$0xff] }
  0x15   :  { %v1059_v3 = vcombine.high %v31_v0, %v35_v1  ;;  %v1058_v5 = vcombine.low %v31_v0, %v35_v1  ;;  %v39_v6 = vld [vmem:[#allocation2 + $0x40] sm:$0xff]  ;;  %v1061_v8 = vcombine.high %v32_v2, %v36_v4  ;;  %v1060_v9 = vcombine.low %v32_v2, %v36_v4  ;;  %v40_v11 = vld [vmem:[#allocation2 + $0x48] sm:$0xff] }
  0x16   :  { %v43_v7 = vld [vmem:[#allocation2 + $0x60] sm:$0xff]  ;;  %v44_v12 = vld [vmem:[#allocation2 + $0x68] sm:$0xff] }
  0x17   :  { %v1067_v10 = vcombine.high %v39_v6, %v43_v7  ;;  %v47_v13 = vld [vmem:[#allocation2 + $0x80] sm:$0xff]  ;;  %851 = vmatprep.subr.bf16.mxu0 %v1059_v3  ;;  %v1069_v14 = vcombine.high %v40_v11, %v44_v12  ;;  %v48_v16 = vld [vmem:[#allocation2 + $0x88] sm:$0xff]  ;;  %894 = vmatprep.subr.bf16.mxu1 %v1061_v8  ;;  %v1066_v18 = vcombine.low %v39_v6, %v43_v7 }
  0x18   :  { %v51_v15 = vld [vmem:[#allocation2 + $0xa0] sm:$0xff]  ;;  %v52_v17 = vld [vmem:[#allocation2 + $0xa8] sm:$0xff]  ;;  %852 = vmatpush1.bf16.msra.mxu0 %v1058_v5  ;;  %895 = vmatpush1.bf16.msra.mxu1 %v1060_v9  ;;  %v1068_v19 = vcombine.low %v40_v11, %v44_v12 }
  0x19   :  { %853 = vmatprep.subr.bf16.mxu0 %v1067_v10  ;;  %v1075_v20 = vcombine.high %v47_v13, %v51_v15  ;;  %896 = vmatprep.subr.bf16.mxu1 %v1069_v14  ;;  %v1077_v21 = vcombine.high %v48_v16, %v52_v17  ;;  %v55_v22 = vld [vmem:[#allocation2 + $0xc0] sm:$0xff]  ;;  %v56_v24 = vld [vmem:[#allocation2 + $0xc8] sm:$0xff]  ;;  %v1074_v26 = vcombine.low %v47_v13, %v51_v15 }
  0x1a   :  { %v59_v23 = vld [vmem:[#allocation2 + $0xe0] sm:$0xff]  ;;  %v60_v25 = vld [vmem:[#allocation2 + $0xe8] sm:$0xff]  ;;  %v1076_v27 = vcombine.low %v48_v16, %v52_v17 }
  0x1b   :  { %v1083_v28 = vcombine.high %v55_v22, %v59_v23  ;;  %v1085_v29 = vcombine.high %v56_v24, %v60_v25  ;;  %v63_v30 = vld [vmem:[#allocation2 + $0x100] sm:$0xff]  ;;  %v64_v32 = vld [vmem:[#allocation2 + $0x108] sm:$0xff]  ;;  %v1082_v34 = vcombine.low %v55_v22, %v59_v23  ;;  %v1084_v35 = vcombine.low %v56_v24, %v60_v25 }
  0x1c   :  { %854 = vmatpush1.bf16.msra.mxu0 %v1066_v18  ;;  %897 = vmatpush1.bf16.msra.mxu1 %v1068_v19  ;;  %v67_v31 = vld [vmem:[#allocation2 + $0x120] sm:$0xff]  ;;  %v68_v33 = vld [vmem:[#allocation2 + $0x128] sm:$0xff] }
  0x1d   :  { %855 = vmatprep.subr.bf16.mxu0 %v1075_v20  ;;  %898 = vmatprep.subr.bf16.mxu1 %v1077_v21  ;;  %v1091_v36 = vcombine.high %v63_v30, %v67_v31  ;;  %v1093_v37 = vcombine.high %v64_v32, %v68_v33  ;;  %v71_v38 = vld [vmem:[#allocation2 + $0x140] sm:$0xff]  ;;  %v72_v40 = vld [vmem:[#allocation2 + $0x148] sm:$0xff]  ;;  %v1090_v42 = vcombine.low %v63_v30, %v67_v31 }
  0x1e   :  { %v75_v39 = vld [vmem:[#allocation2 + $0x160] sm:$0xff]  ;;  %v76_v41 = vld [vmem:[#allocation2 + $0x168] sm:$0xff]  ;;  %v1092_v43 = vcombine.low %v64_v32, %v68_v33 }
  0x1f   :  { %v1099_v44 = vcombine.high %v71_v38, %v75_v39  ;;  %v1101_v45 = vcombine.high %v72_v40, %v76_v41  ;;  %v79_v46 = vld [vmem:[#allocation2 + $0x180] sm:$0xff]  ;;  %v80_v48 = vld [vmem:[#allocation2 + $0x188] sm:$0xff]  ;;  %v1098_v50 = vcombine.low %v71_v38, %v75_v39  ;;  %v1100_v51 = vcombine.low %v72_v40, %v76_v41 }
  0x20   :  { %856 = vmatpush1.bf16.msra.mxu0 %v1074_v26  ;;  %899 = vmatpush1.bf16.msra.mxu1 %v1076_v27  ;;  %v83_v47 = vld [vmem:[#allocation2 + $0x1a0] sm:$0xff]  ;;  %v84_v49 = vld [vmem:[#allocation2 + $0x1a8] sm:$0xff] }
  0x21   :  { %857 = vmatprep.subr.bf16.mxu0 %v1083_v28  ;;  %900 = vmatprep.subr.bf16.mxu1 %v1085_v29  ;;  %v1107_v52 = vcombine.high %v79_v46, %v83_v47  ;;  %v1109_v53 = vcombine.high %v80_v48, %v84_v49  ;;  %v87_v54 = vld [vmem:[#allocation2 + $0x1c0] sm:$0xff]  ;;  %v88_v57 = vld [vmem:[#allocation2 + $0x1c8] sm:$0xff]  ;;  %v1106_v59 = vcombine.low %v79_v46, %v83_v47 }
  0x22   :  { %v91_v55 = vld [vmem:[#allocation2 + $0x1e0] sm:$0xff]  ;;  %v92_v58 = vld [vmem:[#allocation2 + $0x1e8] sm:$0xff]  ;;  %v1108_v60 = vcombine.low %v80_v48, %v84_v49 }
  0x23   :  { %v1284_v56 = vld [vmem:[%s1314_s0 + $0x4] ss:$8 sps:$4 sm:$0xff]   ;;  %v1115_v61 = vcombine.high %v87_v54, %v91_v55  ;;  %v1117_v62 = vcombine.high %v88_v57, %v92_v58  ;;  %v1114_v3 = vcombine.low %v87_v54, %v91_v55  ;;  %v1116_v4 = vcombine.low %v88_v57, %v92_v58 }
  0x24   :  { %858 = vmatpush1.bf16.msra.mxu0 %v1082_v34  ;;  %901 = vmatpush1.bf16.msra.mxu1 %v1084_v35  ;;  %v95_v63 = vld [vmem:[#allocation2 + $0x200] sm:$0xff]  ;;  %v96_v1 = vld [vmem:[#allocation2 + $0x208] sm:$0xff] }
  0x25   :  { %859 = vmatprep.subr.bf16.mxu0 %v1091_v36  ;;  %902 = vmatprep.subr.bf16.mxu1 %v1093_v37  ;;  %v99_v0 = vld [vmem:[#allocation2 + $0x220] sm:$0xff]  ;;  %v100_v2 = vld [vmem:[#allocation2 + $0x228] sm:$0xff] }
  0x26   :  { %883 = vmatprep.mubr.bf16.mxu0 %v1284_v56  ;;  %926 = vmatprep.mubr.bf16.mxu1 %v1284_v56  ;;  %v1123_v5 = vcombine.high %v95_v63, %v99_v0  ;;  %v1125_v6 = vcombine.high %v96_v1, %v100_v2  ;;  %v103_v7 = vld [vmem:[#allocation2 + $0x240] sm:$0xff]  ;;  %v104_v9 = vld [vmem:[#allocation2 + $0x248] sm:$0xff]  ;;  %v1122_v11 = vcombine.low %v95_v63, %v99_v0  ;;  %v33_v0 = vld [vmem:[#allocation2 + $0x10] sm:$0xff] }
  0x27   :  { %v107_v8 = vld [vmem:[#allocation2 + $0x260] sm:$0xff]  ;;  %v108_v10 = vld [vmem:[#allocation2 + $0x268] sm:$0xff]  ;;  %v1124_v12 = vcombine.low %v96_v1, %v100_v2  ;;  %v37_v1 = vld [vmem:[#allocation2 + $0x30] sm:$0xff] }
  0x28   :  { %860 = vmatpush1.bf16.msra.mxu0 %v1090_v42  ;;  %903 = vmatpush1.bf16.msra.mxu1 %v1092_v43  ;;  %v1131_v13 = vcombine.high %v103_v7, %v107_v8  ;;  %v1133_v14 = vcombine.high %v104_v9, %v108_v10  ;;  %v111_v15 = vld [vmem:[#allocation2 + $0x280] sm:$0xff]  ;;  %v112_v17 = vld [vmem:[#allocation2 + $0x288] sm:$0xff]  ;;  %v1130_v19 = vcombine.low %v103_v7, %v107_v8  ;;  %v34_v2 = vld [vmem:[#allocation2 + $0x18] sm:$0xff] }
  0x29   :  { %861 = vmatprep.subr.bf16.mxu0 %v1099_v44  ;;  %904 = vmatprep.subr.bf16.mxu1 %v1101_v45  ;;  %v115_v16 = vld [vmem:[#allocation2 + $0x2a0] sm:$0xff]  ;;  %v116_v18 = vld [vmem:[#allocation2 + $0x2a8] sm:$0xff]  ;;  %v1132_v20 = vcombine.low %v104_v9, %v108_v10  ;;  %v41_v8 = vld [vmem:[#allocation2 + $0x50] sm:$0xff] }
  0x2a   :  { %v1139_v21 = vcombine.high %v111_v15, %v115_v16  ;;  %v1141_v22 = vcombine.high %v112_v17, %v116_v18  ;;  %v119_v23 = vld [vmem:[#allocation2 + $0x2c0] sm:$0xff]  ;;  %v120_v25 = vld [vmem:[#allocation2 + $0x2c8] sm:$0xff]  ;;  %v1138_v27 = vcombine.low %v111_v15, %v115_v16  ;;  %v1140_v28 = vcombine.low %v112_v17, %v116_v18  ;;  %v45_v9 = vld [vmem:[#allocation2 + $0x70] sm:$0xff] }
  0x2b   :  { %v123_v24 = vld [vmem:[#allocation2 + $0x2e0] sm:$0xff]  ;;  %v124_v26 = vld [vmem:[#allocation2 + $0x2e8] sm:$0xff]  ;;  %v1071_v15 = vcombine.high %v41_v8, %v45_v9  ;;  %v49_v17 = vld [vmem:[#allocation2 + $0x90] sm:$0xff] }
  0x2c   :  { %862 = vmatpush1.bf16.msra.mxu0 %v1098_v50  ;;  %905 = vmatpush1.bf16.msra.mxu1 %v1100_v51  ;;  %v1147_v29 = vcombine.high %v119_v23, %v123_v24  ;;  %v1149_v30 = vcombine.high %v120_v25, %v124_v26  ;;  %v127_v31 = vld [vmem:[#allocation2 + $0x300] sm:$0xff]  ;;  %v128_v33 = vld [vmem:[#allocation2 + $0x308] sm:$0xff]  ;;  %v1146_v35 = vcombine.low %v119_v23, %v123_v24  ;;  %v53_v18 = vld [vmem:[#allocation2 + $0xb0] sm:$0xff] }
  0x2d   :  { %863 = vmatprep.subr.bf16.mxu0 %v1107_v52  ;;  %906 = vmatprep.subr.bf16.mxu1 %v1109_v53  ;;  %v131_v32 = vld [vmem:[#allocation2 + $0x320] sm:$0xff]  ;;  %v132_v34 = vld [vmem:[#allocation2 + $0x328] sm:$0xff]  ;;  %v1148_v36 = vcombine.low %v120_v25, %v124_v26  ;;  %v1079_v23 = vcombine.high %v49_v17, %v53_v18  ;;  %v57_v25 = vld [vmem:[#allocation2 + $0xd0] sm:$0xff] }
  0x2e   :  { %v1155_v37 = vcombine.high %v127_v31, %v131_v32  ;;  %v1157_v38 = vcombine.high %v128_v33, %v132_v34  ;;  %v135_v39 = vld [vmem:[#allocation2 + $0x340] sm:$0xff]  ;;  %v136_v41 = vld [vmem:[#allocation2 + $0x348] sm:$0xff]  ;;  %v1154_v43 = vcombine.low %v127_v31, %v131_v32  ;;  %v1156_v44 = vcombine.low %v128_v33, %v132_v34  ;;  %v61_v26 = vld [vmem:[#allocation2 + $0xf0] sm:$0xff] }
  0x2f   :  { %v139_v40 = vld [vmem:[#allocation2 + $0x360] sm:$0xff]  ;;  %v140_v42 = vld [vmem:[#allocation2 + $0x368] sm:$0xff]  ;;  %v1087_v31 = vcombine.high %v57_v25, %v61_v26  ;;  %v65_v33 = vld [vmem:[#allocation2 + $0x110] sm:$0xff] }
  0x30   :  { %864 = vmatpush1.bf16.msra.mxu0 %v1106_v59  ;;  %907 = vmatpush1.bf16.msra.mxu1 %v1108_v60  ;;  %v1163_v45 = vcombine.high %v135_v39, %v139_v40  ;;  %v1165_v46 = vcombine.high %v136_v41, %v140_v42  ;;  %v143_v47 = vld [vmem:[#allocation2 + $0x380] sm:$0xff]  ;;  %v144_v49 = vld [vmem:[#allocation2 + $0x388] sm:$0xff]  ;;  %v1162_v51 = vcombine.low %v135_v39, %v139_v40  ;;  %v69_v34 = vld [vmem:[#allocation2 + $0x130] sm:$0xff] }
  0x31   :  { %865 = vmatprep.subr.bf16.mxu0 %v1115_v61  ;;  %908 = vmatprep.subr.bf16.mxu1 %v1117_v62  ;;  %v147_v48 = vld [vmem:[#allocation2 + $0x3a0] sm:$0xff]  ;;  %v148_v50 = vld [vmem:[#allocation2 + $0x3a8] sm:$0xff]  ;;  %v1164_v52 = vcombine.low %v136_v41, %v140_v42  ;;  %v1095_v39 = vcombine.high %v65_v33, %v69_v34  ;;  %v73_v40 = vld [vmem:[#allocation2 + $0x150] sm:$0xff] }
  0x32   :  { %v1171_v53 = vcombine.high %v143_v47, %v147_v48  ;;  %v1173_v54 = vcombine.high %v144_v49, %v148_v50  ;;  %v151_v55 = vld [vmem:[#allocation2 + $0x3c0] sm:$0xff]  ;;  %v152_v58 = vld [vmem:[#allocation2 + $0x3c8] sm:$0xff]  ;;  %v1170_v60 = vcombine.low %v143_v47, %v147_v48  ;;  %v1172_v61 = vcombine.low %v144_v49, %v148_v50  ;;  %v77_v41 = vld [vmem:[#allocation2 + $0x170] sm:$0xff] }
  0x33   :  { %v155_v57 = vld [vmem:[#allocation2 + $0x3e0] sm:$0xff]  ;;  %v156_v59 = vld [vmem:[#allocation2 + $0x3e8] sm:$0xff]  ;;  %v74_v42 = vld [vmem:[#allocation2 + $0x158] sm:$0xff] }
  0x34   :  { %866 = vmatpush1.bf16.msra.mxu0 %v1114_v3  ;;  %909 = vmatpush1.bf16.msra.mxu1 %v1116_v4  ;;  %v1179_v62 = vcombine.high %v151_v55, %v155_v57  ;;  %v1181_v63 = vcombine.high %v152_v58, %v156_v59  ;;  %v38_v3 = vld [vmem:[#allocation2 + $0x38] sm:$0xff]  ;;  %v1178_v4 = vcombine.low %v151_v55, %v155_v57  ;;  %v1291_v10 = vld [vmem:[%s1314_s0] ss:$8 sps:$4 sm:$0xff]   ;;  %v81_v48 = vld [vmem:[#allocation2 + $0x190] sm:$0xff] }
  0x35   :  { %867 = vmatprep.subr.bf16.mxu0 %v1123_v5  ;;  %910 = vmatprep.subr.bf16.mxu1 %v1125_v6  ;;  %v1180_v5 = vcombine.low %v152_v58, %v156_v59  ;;  %v1063_v6 = vcombine.high %v33_v0, %v37_v1  ;;  %v1065_v7 = vcombine.high %v34_v2, %v38_v3  ;;  %v85_v49 = vld [vmem:[#allocation2 + $0x1b0] sm:$0xff]  ;;  %v82_v50 = vld [vmem:[#allocation2 + $0x198] sm:$0xff] }
  0x36   :  { %v89_v57 = vld [vmem:[#allocation2 + $0x1d0] sm:$0xff]  ;;  %v90_v59 = vld [vmem:[#allocation2 + $0x1d8] sm:$0xff] }
  0x37   :  { %v93_v58 = vld [vmem:[#allocation2 + $0x1f0] sm:$0xff] }
  0x38   :  { %868 = vmatpush1.bf16.msra.mxu0 %v1122_v11  ;;  %911 = vmatpush1.bf16.msra.mxu1 %v1124_v12  ;;  %v42_v11 = vld [vmem:[#allocation2 + $0x58] sm:$0xff] }
  0x39   :  { %869 = vmatprep.subr.bf16.mxu0 %v1131_v13  ;;  %912 = vmatprep.subr.bf16.mxu1 %v1133_v14  ;;  %v46_v12 = vld [vmem:[#allocation2 + $0x78] sm:$0xff]  ;;  %v1062_v13 = vcombine.low %v33_v0, %v37_v1  ;;  %v1064_v14 = vcombine.low %v34_v2, %v38_v3  ;;  %v97_v1 = vld [vmem:[#allocation2 + $0x210] sm:$0xff] }
  0x3a   :  { %v1073_v16 = vcombine.high %v42_v11, %v46_v12  ;;  %v101_v2 = vld [vmem:[#allocation2 + $0x230] sm:$0xff]  ;;  %v98_v3 = vld [vmem:[#allocation2 + $0x218] sm:$0xff] }
  0x3c   :  { %870 = vmatpush1.bf16.msra.mxu0 %v1130_v19  ;;  %913 = vmatpush1.bf16.msra.mxu1 %v1132_v20  ;;  %v50_v19 = vld [vmem:[#allocation2 + $0x98] sm:$0xff] }
  0x3d   :  { %871 = vmatprep.subr.bf16.mxu0 %v1139_v21  ;;  %914 = vmatprep.subr.bf16.mxu1 %v1141_v22  ;;  %v54_v20 = vld [vmem:[#allocation2 + $0xb8] sm:$0xff]  ;;  %v1070_v21 = vcombine.low %v41_v8, %v45_v9  ;;  %v1072_v22 = vcombine.low %v42_v11, %v46_v12  ;;  %v105_v9 = vld [vmem:[#allocation2 + $0x250] sm:$0xff] }
  0x3e   :  { %v1081_v24 = vcombine.high %v50_v19, %v54_v20  ;;  %v109_v11 = vld [vmem:[#allocation2 + $0x270] sm:$0xff]  ;;  %v106_v12 = vld [vmem:[#allocation2 + $0x258] sm:$0xff] }
  0x40   :  { %872 = vmatpush1.bf16.msra.mxu0 %v1138_v27  ;;  %915 = vmatpush1.bf16.msra.mxu1 %v1140_v28  ;;  %v58_v27 = vld [vmem:[#allocation2 + $0xd8] sm:$0xff] }
  0x41   :  { %873 = vmatprep.subr.bf16.mxu0 %v1147_v29  ;;  %916 = vmatprep.subr.bf16.mxu1 %v1149_v30  ;;  %v62_v28 = vld [vmem:[#allocation2 + $0xf8] sm:$0xff]  ;;  %v1078_v29 = vcombine.low %v49_v17, %v53_v18  ;;  %v1080_v30 = vcombine.low %v50_v19, %v54_v20  ;;  %v113_v18 = vld [vmem:[#allocation2 + $0x290] sm:$0xff] }
  0x42   :  { %v1089_v32 = vcombine.high %v58_v27, %v62_v28  ;;  %v117_v19 = vld [vmem:[#allocation2 + $0x2b0] sm:$0xff]  ;;  %v114_v20 = vld [vmem:[#allocation2 + $0x298] sm:$0xff] }
  0x44   :  { %874 = vmatpush1.bf16.msra.mxu0 %v1146_v35  ;;  %917 = vmatpush1.bf16.msra.mxu1 %v1148_v36  ;;  %v66_v35 = vld [vmem:[#allocation2 + $0x118] sm:$0xff] }
  0x45   :  { %875 = vmatprep.subr.bf16.mxu0 %v1155_v37  ;;  %918 = vmatprep.subr.bf16.mxu1 %v1157_v38  ;;  %v70_v36 = vld [vmem:[#allocation2 + $0x138] sm:$0xff]  ;;  %v1086_v37 = vcombine.low %v57_v25, %v61_v26  ;;  %v1088_v38 = vcombine.low %v58_v27, %v62_v28  ;;  %v121_v26 = vld [vmem:[#allocation2 + $0x2d0] sm:$0xff] }
  0x46   :  { %v125_v27 = vld [vmem:[#allocation2 + $0x2f0] sm:$0xff]  ;;  %v122_v28 = vld [vmem:[#allocation2 + $0x2d8] sm:$0xff] }
  0x48   :  { %876 = vmatpush1.bf16.msra.mxu0 %v1154_v43  ;;  %919 = vmatpush1.bf16.msra.mxu1 %v1156_v44  ;;  %v78_v43 = vld [vmem:[#allocation2 + $0x178] sm:$0xff]  ;;  %v1094_v44 = vcombine.low %v65_v33, %v69_v34  ;;  %v129_v34 = vld [vmem:[#allocation2 + $0x310] sm:$0xff] }
  0x49   :  { %877 = vmatprep.subr.bf16.mxu0 %v1163_v45  ;;  %920 = vmatprep.subr.bf16.mxu1 %v1165_v46  ;;  %v1096_v45 = vcombine.low %v66_v35, %v70_v36  ;;  %v1103_v46 = vcombine.high %v73_v40, %v77_v41  ;;  %v1105_v47 = vcombine.high %v74_v42, %v78_v43 }
  0x4c   :  { %878 = vmatpush1.bf16.msra.mxu0 %v1162_v51  ;;  %921 = vmatpush1.bf16.msra.mxu1 %v1164_v52  ;;  %v86_v51 = vld [vmem:[#allocation2 + $0x1b8] sm:$0xff]  ;;  %v1102_v52 = vcombine.low %v73_v40, %v77_v41  ;;  %v137_v41 = vld [vmem:[#allocation2 + $0x350] sm:$0xff] }
  0x4d   :  { %879 = vmatprep.subr.bf16.mxu0 %v1171_v53  ;;  %922 = vmatprep.subr.bf16.mxu1 %v1173_v54  ;;  %v1104_v53 = vcombine.low %v74_v42, %v78_v43  ;;  %v1111_v54 = vcombine.high %v81_v48, %v85_v49  ;;  %v1113_v55 = vcombine.high %v82_v50, %v86_v51  ;;  %v141_v42 = vld [vmem:[#allocation2 + $0x370] sm:$0xff]  ;;  %v138_v43 = vld [vmem:[#allocation2 + $0x358] sm:$0xff] }
  0x50   :  { %880 = vmatpush1.bf16.msra.mxu0 %v1170_v60  ;;  %923 = vmatpush1.bf16.msra.mxu1 %v1172_v61  ;;  %v94_v60 = vld [vmem:[#allocation2 + $0x1f8] sm:$0xff]  ;;  %v1110_v61 = vcombine.low %v81_v48, %v85_v49  ;;  %v145_v49 = vld [vmem:[#allocation2 + $0x390] sm:$0xff] }
  0x51   :  { %881 = vmatprep.subr.bf16.mxu0 %v1179_v62  ;;  %924 = vmatprep.subr.bf16.mxu1 %v1181_v63  ;;  %v1112_v62 = vcombine.low %v82_v50, %v86_v51  ;;  %v1119_v63 = vcombine.high %v89_v57, %v93_v58  ;;  %v1121_v0 = vcombine.high %v90_v59, %v94_v60  ;;  %v149_v50 = vld [vmem:[#allocation2 + $0x3b0] sm:$0xff]  ;;  %v146_v51 = vld [vmem:[#allocation2 + $0x398] sm:$0xff] }
  0x54   :  { %882 = vmatpush1.bf16.msra.mxu0 %v1178_v4  ;;  %925 = vmatpush1.bf16.msra.mxu1 %v1180_v5  ;;  %v102_v4 = vld [vmem:[#allocation2 + $0x238] sm:$0xff]  ;;  %v1118_v5 = vcombine.low %v89_v57, %v93_v58  ;;  %v153_v58 = vld [vmem:[#allocation2 + $0x3d0] sm:$0xff] }
  0x55   :  { %937 = vmatprep.subr.bf16.mxu0 %v1063_v6  ;;  %980 = vmatprep.subr.bf16.mxu1 %v1065_v7  ;;  %v1120_v6 = vcombine.low %v90_v59, %v94_v60  ;;  %v1127_v7 = vcombine.high %v97_v1, %v101_v2  ;;  %v1129_v8 = vcombine.high %v98_v3, %v102_v4  ;;  %v157_v59 = vld [vmem:[#allocation2 + $0x3f0] sm:$0xff]  ;;  %v154_v60 = vld [vmem:[#allocation2 + $0x3d8] sm:$0xff] }
  0x57   :  { %884 = vmatmul.mubr.bf16.vlgmr.msra.gmra.mrb[0].mxu0 %v1291_v10  ;;  %927 = vmatmul.mubr.bf16.vlgmr.msra.gmra.mrb[0].mxu1 %v1291_v10 }
  0x58   :  { %938 = vmatpush1.bf16.msra.mxu0 %v1062_v13  ;;  %981 = vmatpush1.bf16.msra.mxu1 %v1064_v14  ;;  %v110_v13 = vld [vmem:[#allocation2 + $0x278] sm:$0xff]  ;;  %v1126_v14 = vcombine.low %v97_v1, %v101_v2  ;;  %v1182_v2 = vcombine.low %v153_v58, %v157_v59 }
  0x59   :  { %939 = vmatprep.subr.bf16.mxu0 %v1071_v15  ;;  %982 = vmatprep.subr.bf16.mxu1 %v1073_v16  ;;  %v1128_v15 = vcombine.low %v98_v3, %v102_v4  ;;  %v1135_v16 = vcombine.high %v105_v9, %v109_v11  ;;  %v1137_v17 = vcombine.high %v106_v12, %v110_v13  ;;  %v161_v4 = vlaneseq }
  0x5a   :  { %969 = vmatprep.mubr.bf16.mxu0 %v1284_v56  ;;  %1012 = vmatprep.mubr.bf16.mxu1 %v1284_v56  ;;  %v1097_v56 = vcombine.high %v66_v35, %v70_v36  ;;  %v133_v35 = vld [vmem:[#allocation2 + $0x330] sm:$0xff]  ;;  %v130_v36 = vld [vmem:[#allocation2 + $0x318] sm:$0xff] }
  0x5c   :  { %940 = vmatpush1.bf16.msra.mxu0 %v1070_v21  ;;  %983 = vmatpush1.bf16.msra.mxu1 %v1072_v22  ;;  %v118_v21 = vld [vmem:[#allocation2 + $0x2b8] sm:$0xff]  ;;  %v1134_v22 = vcombine.low %v105_v9, %v109_v11 }
  0x5d   :  { %941 = vmatprep.subr.bf16.mxu0 %v1079_v23  ;;  %984 = vmatprep.subr.bf16.mxu1 %v1081_v24  ;;  %v1136_v23 = vcombine.low %v106_v12, %v110_v13  ;;  %v1143_v24 = vcombine.high %v113_v18, %v117_v19  ;;  %v1145_v25 = vcombine.high %v114_v20, %v118_v21 }
  0x60   :  { %942 = vmatpush1.bf16.msra.mxu0 %v1078_v29  ;;  %985 = vmatpush1.bf16.msra.mxu1 %v1080_v30  ;;  %v126_v29 = vld [vmem:[#allocation2 + $0x2f8] sm:$0xff]  ;;  %v1142_v30 = vcombine.low %v113_v18, %v117_v19 }
  0x61   :  { %943 = vmatprep.subr.bf16.mxu0 %v1087_v31  ;;  %986 = vmatprep.subr.bf16.mxu1 %v1089_v32  ;;  %v1144_v31 = vcombine.low %v114_v20, %v118_v21  ;;  %v1151_v32 = vcombine.high %v121_v26, %v125_v27  ;;  %v1153_v33 = vcombine.high %v122_v28, %v126_v29 }
  0x64   :  { %944 = vmatpush1.bf16.msra.mxu0 %v1086_v37  ;;  %987 = vmatpush1.bf16.msra.mxu1 %v1088_v38  ;;  %v134_v37 = vld [vmem:[#allocation2 + $0x338] sm:$0xff]  ;;  %v1150_v38 = vcombine.low %v121_v26, %v125_v27 }
  0x65   :  { %945 = vmatprep.subr.bf16.mxu0 %v1095_v39  ;;  %988 = vmatprep.subr.bf16.mxu1 %v1097_v56  ;;  %v1152_v39 = vcombine.low %v122_v28, %v126_v29  ;;  %v1159_v56 = vcombine.high %v129_v34, %v133_v35  ;;  %v1161_v40 = vcombine.high %v130_v36, %v134_v37 }
  0x68   :  { %946 = vmatpush1.bf16.msra.mxu0 %v1094_v44  ;;  %989 = vmatpush1.bf16.msra.mxu1 %v1096_v45  ;;  %v142_v44 = vld [vmem:[#allocation2 + $0x378] sm:$0xff]  ;;  %v1158_v45 = vcombine.low %v129_v34, %v133_v35 }
  0x69   :  { %947 = vmatprep.subr.bf16.mxu0 %v1103_v46  ;;  %990 = vmatprep.subr.bf16.mxu1 %v1105_v47  ;;  %v1160_v46 = vcombine.low %v130_v36, %v134_v37  ;;  %v1167_v47 = vcombine.high %v137_v41, %v141_v42  ;;  %v1169_v48 = vcombine.high %v138_v43, %v142_v44 }
  0x6c   :  { %948 = vmatpush1.bf16.msra.mxu0 %v1102_v52  ;;  %991 = vmatpush1.bf16.msra.mxu1 %v1104_v53  ;;  %v150_v52 = vld [vmem:[#allocation2 + $0x3b8] sm:$0xff]  ;;  %v1166_v53 = vcombine.low %v137_v41, %v141_v42 }
  0x6d   :  { %949 = vmatprep.subr.bf16.mxu0 %v1111_v54  ;;  %992 = vmatprep.subr.bf16.mxu1 %v1113_v55  ;;  %v1168_v54 = vcombine.low %v138_v43, %v142_v44  ;;  %v1175_v55 = vcombine.high %v145_v49, %v149_v50  ;;  %v1177_v57 = vcombine.high %v146_v51, %v150_v52 }
  0x70   :  { %950 = vmatpush1.bf16.msra.mxu0 %v1110_v61  ;;  %993 = vmatpush1.bf16.msra.mxu1 %v1112_v62  ;;  %v158_v61 = vld [vmem:[#allocation2 + $0x3f8] sm:$0xff]  ;;  %v1174_v62 = vcombine.low %v145_v49, %v149_v50 }
  0x71   :  { %951 = vmatprep.subr.bf16.mxu0 %v1119_v63  ;;  %994 = vmatprep.subr.bf16.mxu1 %v1121_v0  ;;  %v1176_v63 = vcombine.low %v146_v51, %v150_v52  ;;  %v1183_v0 = vcombine.high %v153_v58, %v157_v59  ;;  %v1185_v1 = vcombine.high %v154_v60, %v158_v61 }
  0x72   :  { %v1184_v3 = vcombine.low %v154_v60, %v158_v61 }
  0x74   :  { %952 = vmatpush1.bf16.msra.mxu0 %v1118_v5  ;;  %995 = vmatpush1.bf16.msra.mxu1 %v1120_v6  ;;  %v162_v5 = vshrl.u32 %v161_v4, 7 }
  0x75   :  { %953 = vmatprep.subr.bf16.mxu0 %v1127_v7  ;;  %996 = vmatprep.subr.bf16.mxu1 %v1129_v8  ;;  %v159_v7 = vld [vmem:[%s1316_s2] sm:$0xff]  ;;  %s1246_s2 = smov [#allocation5]  }
  0x76   :  { %v163_v6 = vsub.s32 0, %v162_v5  ;;  %v171_v8 = vsub.s32 2, %v162_v5  ;;  %v167_v9 = vsub.s32 1, %v162_v5  ;;  %v175_v11 = vsub.s32 3, %v162_v5  ;;  %s1044_s30 = sshll.u32 %s1246_s2, 4  ;;  %s1045_s30 = int_to_ptr.vmem [resolvable:$true] %s1044_s30 }
  0x77   :  { %v191_v34 = vsub.s32 7, %v162_v5  ;;  %s1217_s4 = scalar_lea.vmem %s1045_s30, 2048  ;;  %p1222_p9 = scmp.lt.s32.totalorder %s1045_s30, %s1045_s30 }
  0x78   :  { %954 = vmatpush1.bf16.msra.mxu0 %v1126_v14  ;;  %997 = vmatpush1.bf16.msra.mxu1 %v1128_v15  ;;  %v164_v12 = vrot.slane %v159_v7, %v163_v6  ;;  %v172_v13 = vrot.slane %v159_v7, %v171_v8  ;;  %v168_v14 = vrot.slane %v159_v7, %v167_v9  ;;  %p1218_p8 = scmp.ne.s32.totalorder %s1045_s30, %s1217_s4  ;;  %p1223_p10 = scmp.lt.s32.totalorder %s1217_s4, %s1217_s4 }
  0x79   :  { %955 = vmatprep.subr.bf16.mxu0 %v1135_v16  ;;  %998 = vmatprep.subr.bf16.mxu1 %v1137_v17  ;;  %v176_v15 = vrot.slane %v159_v7, %v175_v11 }
  0x7a   :  { %p1224_p11 = por %p1223_p10, %p1222_p9 }
  0x7c   :  { %956 = vmatpush1.bf16.msra.mxu0 %v1134_v22  ;;  %999 = vmatpush1.bf16.msra.mxu1 %v1136_v23  ;;  %p1225_p12 = pnand %p1224_p11, %p1218_p8 }
  0x7d   :  { %957 = vmatprep.subr.bf16.mxu0 %v1143_v24  ;;  %1000 = vmatprep.subr.bf16.mxu1 %v1145_v25 }
  0x80   :  { %958 = vmatpush1.bf16.msra.mxu0 %v1142_v30  ;;  %1001 = vmatpush1.bf16.msra.mxu1 %v1144_v31  ;;  %v179_v31 = vsub.s32 4, %v162_v5 }
  0x81   :  { %959 = vmatprep.subr.bf16.mxu0 %v1151_v32  ;;  %1002 = vmatprep.subr.bf16.mxu1 %v1153_v33  ;;  %v187_v32 = vsub.s32 6, %v162_v5  ;;  %v183_v33 = vsub.s32 5, %v162_v5 }
  0x82   :  { %v180_v35 = vrot.slane %v159_v7, %v179_v31 }
  0x83   :  { %v188_v36 = vrot.slane %v159_v7, %v187_v32  ;;  %v184_v37 = vrot.slane %v159_v7, %v183_v33 }
  0x84   :  { %960 = vmatpush1.bf16.msra.mxu0 %v1150_v38  ;;  %1003 = vmatpush1.bf16.msra.mxu1 %v1152_v39  ;;  %v192_v38 = vrot.slane %v159_v7, %v191_v34 }
  0x85   :  { %961 = vmatprep.subr.bf16.mxu0 %v1159_v56  ;;  %1004 = vmatprep.subr.bf16.mxu1 %v1161_v40 }
  0x88   :  { %962 = vmatpush1.bf16.msra.mxu0 %v1158_v45  ;;  %1005 = vmatpush1.bf16.msra.mxu1 %v1160_v46 }
  0x89   :  { %963 = vmatprep.subr.bf16.mxu0 %v1167_v47  ;;  %1006 = vmatprep.subr.bf16.mxu1 %v1169_v48 }
  0x8c   :  { %964 = vmatpush1.bf16.msra.mxu0 %v1166_v53  ;;  %1007 = vmatpush1.bf16.msra.mxu1 %v1168_v54 }
  0x8d   :  { %965 = vmatprep.subr.bf16.mxu0 %v1175_v55  ;;  %1008 = vmatprep.subr.bf16.mxu1 %v1177_v57 }
  0x90   :  { %966 = vmatpush1.bf16.msra.mxu0 %v1174_v62  ;;  %1009 = vmatpush1.bf16.msra.mxu1 %v1176_v63 }
  0x91   :  { %967 = vmatprep.subr.bf16.mxu0 %v1183_v0  ;;  %1010 = vmatprep.subr.bf16.mxu1 %v1185_v1 }
  0x94   :  { %968 = vmatpush1.bf16.msra.mxu0 %v1182_v2  ;;  %1011 = vmatpush1.bf16.msra.mxu1 %v1184_v3 }
  0x97   :  { %970 = vmatmul.mubr.bf16.vlgmr.msra.gmra.mrb[4].mxu0 %v1291_v10  ;;  %1013 = vmatmul.mubr.bf16.vlgmr.msra.gmra.mrb[4].mxu1 %v1291_v10 }
 0x12a   :  { %v885_v16 = vpop.f32.mrb[0].mxu0  ;;  %v928_v18 = vpop.f32.mrb[0].mxu1 }
 0x12b   :  { %v886_v17 = vadd.f32 %v885_v16, %v164_v12  ;;  %v887_v19 = vpop.f32.mrb[1].mxu0  ;;  %v929_v20 = vadd.f32 %v928_v18, %v172_v13  ;;  %v930_v21 = vpop.f32.mrb[1].mxu1 }
 0x12c   :  { %v888_v10 = vadd.f32 %v887_v19, %v168_v14  ;;  %v889_v22 = vpop.f32.mrb[2].mxu0  ;;  %v931_v23 = vadd.f32 %v930_v21, %v176_v15  ;;  %v932_v25 = vpop.f32.mrb[2].mxu1 }
 0x12d   :  { %1023 = vst [vmem:[#allocation5] sm:$0xff] %v886_v17  ;;  %v890_v24 = vadd.f32 %v889_v22, %v164_v12  ;;  %v891_v26 = vpop.f32.mrb[3].mxu0  ;;  %1025 = vst [vmem:[#allocation5 + $0x10] sm:$0xff] %v929_v20  ;;  %v933_v27 = vadd.f32 %v932_v25, %v172_v13  ;;  %v934_v29 = vpop.f32.mrb[3].mxu1 }
 0x12e   :  { %1024 = vst [vmem:[#allocation5 + $0x8] sm:$0xff] %v888_v10  ;;  %v892_v28 = vadd.f32 %v891_v26, %v168_v14  ;;  %1026 = vst [vmem:[#allocation5 + $0x18] sm:$0xff] %v931_v23  ;;  %v935_v30 = vadd.f32 %v934_v29, %v176_v15 }
 0x12f   :  { %1031 = vst [vmem:[#allocation5 + $0x40] sm:$0xff] %v890_v24  ;;  %1033 = vst [vmem:[#allocation5 + $0x50] sm:$0xff] %v933_v27 }
 0x130   :  { %1032 = vst [vmem:[#allocation5 + $0x48] sm:$0xff] %v892_v28  ;;  %1034 = vst [vmem:[#allocation5 + $0x58] sm:$0xff] %v935_v30 }
 0x16a   :  { %v971_v39 = vpop.f32.mrb[4].mxu0  ;;  %v1014_v40 = vpop.f32.mrb[4].mxu1 }
 0x16b   :  { %v972_v56 = vadd.f32 %v971_v39, %v180_v35  ;;  %v973_v41 = vpop.f32.mrb[5].mxu0  ;;  %v1015_v42 = vadd.f32 %v1014_v40, %v188_v36  ;;  %v1016_v44 = vpop.f32.mrb[5].mxu1 }
 0x16c   :  { %v974_v43 = vadd.f32 %v973_v41, %v184_v37  ;;  %v975_v45 = vpop.f32.mrb[6].mxu0  ;;  %v1017_v46 = vadd.f32 %v1016_v44, %v192_v38  ;;  %v1018_v48 = vpop.f32.mrb[6].mxu1 }
 0x16d   :  { %1027 = vst [vmem:[#allocation5 + $0x20] sm:$0xff] %v972_v56  ;;  %v976_v47 = vadd.f32 %v975_v45, %v180_v35  ;;  %v977_v49 = vpop.f32.mrb[7].mxu0  ;;  %1029 = vst [vmem:[#allocation5 + $0x30] sm:$0xff] %v1015_v42  ;;  %v1019_v50 = vadd.f32 %v1018_v48, %v188_v36  ;;  %v1020_v52 = vpop.f32.mrb[7].mxu1 }
 0x16e   :  { %1028 = vst [vmem:[#allocation5 + $0x28] sm:$0xff] %v974_v43  ;;  %v978_v51 = vadd.f32 %v977_v49, %v184_v37  ;;  %1030 = vst [vmem:[#allocation5 + $0x38] sm:$0xff] %v1017_v46  ;;  %v1021_v53 = vadd.f32 %v1020_v52, %v192_v38 }
 0x16f   :  { %1035 = vst [vmem:[#allocation5 + $0x60] sm:$0xff] %v976_v47  ;;  %1037 = vst [vmem:[#allocation5 + $0x70] sm:$0xff] %v1019_v50 }
 0x170   :  { %1036 = vst [vmem:[#allocation5 + $0x68] sm:$0xff] %v978_v51  ;;  %1038 = vst [vmem:[#allocation5 + $0x78] sm:$0xff] %v1021_v53 }
 0x171   :  { %1228 = shalt.err (!%p1225_p12)
}
 0x172   :  { %s1229_s7 = scalar_lea.hbm %s1317_s3, 2048 }
 0x173   :  { %p1230_p13 = scmp.ne.s32.totalorder %s1317_s3, %s1229_s7  ;;  %p1233_p0 = scmp.lt.u32.totalorder %s1229_s7, %s1317_s3 }
 0x175   :  { %p1235_p1 = pnand %p1233_p0, %p1230_p13 }
 0x177   :  { %1238 = shalt.err (!%p1235_p1)
}
 0x178   :  { %s1247_s12 = smov 1024   ;;  %s1248_s13 = smov 64  }
 0x179   :  { %1050 = dma.vmem_to_hbm [thread:$0]  %s1045_s30, 2048, %s1317_s3, [#allocation4], %s1247_s12, %s1247_s12, %s1248_s13  }
 0x17a   :  { %1241 = dma.done.wait [#allocation4], 2048  }
 0x17b   :  { %1242 = vsyncadd [#allocation4], 4294965248 }
 0x17c   :  { %1054 = vsyncpa [#allocation3], 1 }
 0x17d   :  { %1055 = vsyncpa [#allocation4], 1 }

</bundles_post_ra>
